<compile_context>
chip_gen: v7x
topology: tpu7x:2x2x1
jax: 0.10.0
libtpu: 0.0.40
codegen_flags: <defaults>
</compile_context>

<pallas_src>
import jax
import jax.numpy as jnp
from jax.experimental import pallas as pl
from jax.experimental.pallas import tpu as pltpu


def _round_up(x: int, m: int) -> int:
    return ((x + m - 1) // m) * m


def _cls_head_kernel(x_ref, wd_ref, bd_ref, wo_ref, bo_ref, out_ref):
    # x_ref: (TB, H) bf16 CLS activations for this batch tile.
    # wd_ref/wo_ref: bf16 weights; bd_ref/bo_ref: f32 biases (1, H)/(1, L_pad).

    # dense: bf16 x @ bf16 Wd -> f32 accumulation on the MXU, + bias, tanh.
    h = jnp.dot(x_ref[...], wd_ref[...], preferred_element_type=jnp.float32)
    h = jnp.tanh(h + bd_ref[...])                                # (TB, H) f32

    # out_proj: cast right at the MXU input; lane-padded L, f32 accumulation.
    y = jnp.dot(h.astype(wo_ref.dtype), wo_ref[...],
                preferred_element_type=jnp.float32)
    out_ref[...] = (y + bo_ref[...]).astype(out_ref.dtype)       # (TB, L_pad)


def prepare_head_params(w_dense, b_dense, w_out, b_out,
                        *, matmul_dtype=jnp.bfloat16):
    """One-time parameter prep: lane-pad num_labels to a multiple of 128 and
    cast matmul operands to bf16 (biases stay f32)."""
    H = w_dense.shape[0]
    L = w_out.shape[1]
    L_pad = _round_up(L, 128)
    if L_pad != L:
        w_out = jnp.pad(w_out, ((0, 0), (0, L_pad - L)))
        b_out = jnp.pad(b_out, ((0, L_pad - L),))
    return (w_dense.astype(matmul_dtype),
            b_dense.reshape(1, H).astype(jnp.float32),
            w_out.astype(matmul_dtype),
            b_out.reshape(1, L_pad).astype(jnp.float32),
            L)


def roberta_classification_head(features, params, *, block_b: int = 512,
                                out_dtype=jnp.float32):
    """features: (B, S, H); params: output of prepare_head_params().
       Returns f32 logits (B, num_labels). Eval mode (dropout = identity)."""
    w_dense, b_dense2, w_out, b_out2, L = params
    B, S, H = features.shape
    L_pad = w_out.shape[1]
    matmul_dtype = w_dense.dtype

    # --- CLS select in the wrapper: clean (B, H) layout, cast for the MXU. ---
    x = features[:, 0, :].astype(matmul_dtype)                   # (B, H)

    # --- Batch tiling: >= 2 tiles when possible (v7x megacore), sublane*8. ---
    TB = min(block_b, max(8, _round_up(-(-B // 2), 8)))
    B_pad = _round_up(B, TB)
    if B_pad != B:
        x = jnp.pad(x, ((0, B_pad - B), (0, 0)))

    grid = (B_pad // TB,)

    # --- VMEM budget: x/out double-buffered, constant weights single-buffered.
    bpe = jnp.dtype(matmul_dtype).itemsize
    out_bpe = jnp.dtype(out_dtype).itemsize
    vmem_bytes = (2 * TB * H * bpe                       # x (Buffered(2))
                  + H * H * bpe + H * 4                  # w_dense + b_dense
                  + H * L_pad * bpe + L_pad * 4          # w_out + b_out
                  + 2 * TB * L_pad * out_bpe)            # out (Buffered(2))
    vmem_limit = int(min(64 * 2**20, max(16 * 2**20, 1.25 * vmem_bytes)))

    # Advisory cost estimate so XLA schedules neighbours around the call well.
    cost = pl.CostEstimate(
        flops=2 * B_pad * H * (H + L_pad),
        transcendentals=B_pad * H,
        bytes_accessed=(x.size * bpe
                        + w_dense.size * bpe
                        + b_dense2.size * 4
                        + w_out.size * bpe
                        + b_out2.size * 4
                        + B_pad * L_pad * out_bpe),
    )

    logits_pad = pl.pallas_call(
        _cls_head_kernel,
        out_shape=jax.ShapeDtypeStruct((B_pad, L_pad), out_dtype),
        grid_spec=pltpu.PrefetchScalarGridSpec(
            num_scalar_prefetch=0,
            grid=grid,
            in_specs=[
                # Activations: one batch tile per grid step (double-buffered).
                pl.BlockSpec((TB, H), lambda i: (i, 0)),
                # Weights / biases: constant block index -> VMEM-resident,
                # single-buffered (they never change across the grid).
                pl.BlockSpec((H, H), lambda i: (0, 0),
                             pipeline_mode=pl.Buffered(1)),
                pl.BlockSpec((1, H), lambda i: (0, 0),
                             pipeline_mode=pl.Buffered(1)),
                pl.BlockSpec((H, L_pad), lambda i: (0, 0),
                             pipeline_mode=pl.Buffered(1)),
                pl.BlockSpec((1, L_pad), lambda i: (0, 0),
                             pipeline_mode=pl.Buffered(1)),
            ],
            out_specs=pl.BlockSpec((TB, L_pad), lambda i: (i, 0)),
        ),
        compiler_params=pltpu.CompilerParams(
            dimension_semantics=("parallel",),
            vmem_limit_bytes=vmem_limit),
        cost_estimate=cost,
    )(x, w_dense, b_dense2, w_out, b_out2)

    # Strip the batch / label padding.
    return logits_pad[:B, :L]


if __name__ == "__main__":
    # Small synthetic config: hidden_size=32, num_labels=4, batch=2, seq=8.
    B, S, H, L = 2, 8, 32, 4

    key = jax.random.PRNGKey(0)
    k_feat, k_wd, k_bd, k_wo, k_bo = jax.random.split(key, 5)

    features = jax.random.normal(k_feat, (B, S, H), dtype=jnp.float32)
    # nn.Linear-style params, stored pre-transposed as [in, out].
    w_dense = jax.random.normal(k_wd, (H, H), dtype=jnp.float32) * 0.02
    b_dense = jax.random.normal(k_bd, (H,), dtype=jnp.float32) * 0.02
    w_out = jax.random.normal(k_wo, (H, L), dtype=jnp.float32) * 0.02
    b_out = jax.random.normal(k_bo, (L,), dtype=jnp.float32) * 0.02

    params = prepare_head_params(w_dense, b_dense, w_out, b_out)
    logits = roberta_classification_head(features, params)
    logits = jax.block_until_ready(logits)
    assert logits.shape == (B, L)

    # Reference 1: same bf16-operand / f32-accumulation recipe (tight check).
    x = features[:, 0, :]
    xb = x.astype(jnp.bfloat16)
    wdb = w_dense.astype(jnp.bfloat16)
    wob = w_out.astype(jnp.bfloat16)
    h_ref = jnp.tanh(jnp.dot(xb, wdb, preferred_element_type=jnp.float32)
                     + b_dense)
    ref_bf16 = (jnp.dot(h_ref.astype(jnp.bfloat16), wob,
                        preferred_element_type=jnp.float32) + b_out)
    assert jnp.allclose(logits, ref_bf16, atol=1e-4, rtol=1e-3), \
        "mismatch vs bf16-operand reference"

    # Reference 2: full-f32 math (loose check, bounds the bf16 cast error).
    ref_f32 = jnp.tanh(x @ w_dense + b_dense) @ w_out + b_out
    assert jnp.allclose(logits, ref_f32, atol=3e-2, rtol=3e-2), \
        "mismatch vs f32 reference"

    print("KERNEL_OK")
</pallas_src>

<mosaic_0001>
module attributes {stable_mosaic.version = 11 : i64} {
  func.func @_cls_head_kernel(%arg0: i32, %arg1: memref<8x32xbf16, #tpu.memory_space<vmem>>, %arg2: memref<32x32xbf16, #tpu.memory_space<vmem>>, %arg3: memref<1x32xf32, #tpu.memory_space<vmem>>, %arg4: memref<32x128xbf16, #tpu.memory_space<vmem>>, %arg5: memref<1x128xf32, #tpu.memory_space<vmem>>, %arg6: memref<8x128xf32, #tpu.memory_space<vmem>>) attributes {dimension_semantics = [#tpu.dimension_semantics<parallel>], iteration_bounds = array<i64: 1>, scalar_prefetch = 0 : i64, scratch_operands = 0 : i64, tpu.core_type = #tpu.core_type<tc>, window_params = [{transform_indices = @transform_0, window_bounds = array<i64: 8, 32>}, {pipeline_mode = #tpu.pipeline_mode<synchronous>, transform_indices = @transform_1, window_bounds = array<i64: 32, 32>}, {pipeline_mode = #tpu.pipeline_mode<synchronous>, transform_indices = @transform_2, window_bounds = array<i64: 1, 32>}, {pipeline_mode = #tpu.pipeline_mode<synchronous>, transform_indices = @transform_3, window_bounds = array<i64: 32, 128>}, {pipeline_mode = #tpu.pipeline_mode<synchronous>, transform_indices = @transform_4, window_bounds = array<i64: 1, 128>}, {transform_indices = @transform_5, window_bounds = array<i64: 8, 128>}]} {
    %c0 = arith.constant 0 : index
    %c0_0 = arith.constant 0 : index
    %0 = vector.load %arg1[%c0, %c0_0] : memref<8x32xbf16, #tpu.memory_space<vmem>>, vector<8x32xbf16>
    %c0_1 = arith.constant 0 : index
    %c0_2 = arith.constant 0 : index
    %1 = vector.load %arg2[%c0_1, %c0_2] : memref<32x32xbf16, #tpu.memory_space<vmem>>, vector<32x32xbf16>
    %cst = arith.constant dense<0.000000e+00> : vector<8x32xf32>
    %2 = tpu.matmul %0, %1, %cst {dimension_numbers = #tpu.dot_dimension_numbers<[1], [0], [0], [1], [0, 0, 1, 1], [], []>} : vector<8x32xbf16>, vector<32x32xbf16>, vector<8x32xf32> -> vector<8x32xf32>
    %c0_3 = arith.constant 0 : index
    %c0_4 = arith.constant 0 : index
    %3 = vector.load %arg3[%c0_3, %c0_4] : memref<1x32xf32, #tpu.memory_space<vmem>>, vector<1x32xf32>
    %4 = vector.broadcast %3 : vector<1x32xf32> to vector<8x32xf32>
    %5 = arith.addf %2, %4 : vector<8x32xf32>
    %6 = math.tanh %5 : vector<8x32xf32>
    %7 = arith.truncf %6 : vector<8x32xf32> to vector<8x32xbf16>
    %c0_5 = arith.constant 0 : index
    %c0_6 = arith.constant 0 : index
    %8 = vector.load %arg4[%c0_5, %c0_6] : memref<32x128xbf16, #tpu.memory_space<vmem>>, vector<32x128xbf16>
    %cst_7 = arith.constant dense<0.000000e+00> : vector<8x128xf32>
    %9 = tpu.matmul %7, %8, %cst_7 {dimension_numbers = #tpu.dot_dimension_numbers<[1], [0], [0], [1], [0, 0, 1, 1], [], []>} : vector<8x32xbf16>, vector<32x128xbf16>, vector<8x128xf32> -> vector<8x128xf32>
    %c0_8 = arith.constant 0 : index
    %c0_9 = arith.constant 0 : index
    %10 = vector.load %arg5[%c0_8, %c0_9] : memref<1x128xf32, #tpu.memory_space<vmem>>, vector<1x128xf32>
    %11 = vector.broadcast %10 : vector<1x128xf32> to vector<8x128xf32>
    %12 = arith.addf %9, %11 : vector<8x128xf32>
    %c0_10 = arith.constant 0 : index
    %c0_11 = arith.constant 0 : index
    %13 = vector.load %arg6[%c0_10, %c0_11] : memref<8x128xf32, #tpu.memory_space<vmem>>, vector<8x128xf32>
    tpu.vector_store %arg6[%c0_10, %c0_11], %12 {strides = array<i32>} : memref<8x128xf32, #tpu.memory_space<vmem>>, vector<8x128xf32>,
    return
  }
  func.func @transform_0(%arg0: i32) -> (i32, i32) {
    %c0_i32 = arith.constant 0 : i32
    %c0_i32_0 = arith.constant 0 : i32
    return %arg0, %c0_i32 : i32, i32
  }
  func.func @transform_1(%arg0: i32) -> (i32, i32) {
    %c0_i32 = arith.constant 0 : i32
    %c0_i32_0 = arith.constant 0 : i32
    %c0_i32_1 = arith.constant 0 : i32
    return %c0_i32, %c0_i32_0 : i32, i32
  }
  func.func @transform_2(%arg0: i32) -> (i32, i32) {
    %c0_i32 = arith.constant 0 : i32
    %c0_i32_0 = arith.constant 0 : i32
    %c0_i32_1 = arith.constant 0 : i32
    return %c0_i32, %c0_i32_0 : i32, i32
  }
  func.func @transform_3(%arg0: i32) -> (i32, i32) {
    %c0_i32 = arith.constant 0 : i32
    %c0_i32_0 = arith.constant 0 : i32
    %c0_i32_1 = arith.constant 0 : i32
    return %c0_i32, %c0_i32_0 : i32, i32
  }
  func.func @transform_4(%arg0: i32) -> (i32, i32) {
    %c0_i32 = arith.constant 0 : i32
    %c0_i32_0 = arith.constant 0 : i32
    %c0_i32_1 = arith.constant 0 : i32
    return %c0_i32, %c0_i32_0 : i32, i32
  }
  func.func @transform_5(%arg0: i32) -> (i32, i32) {
    %c0_i32 = arith.constant 0 : i32
    %c0_i32_0 = arith.constant 0 : i32
    return %arg0, %c0_i32 : i32, i32
  }
}

</mosaic_0001>

<bundles_post_ra>
// kernel: tpu_custom_call.1
= control target key start
LH: loop header
LB: loop body
LE: loop exit
PB: predicated region body
PF: predicated region fallthrough
CT: control target
= control target key end

     0   :  { %10 = vsyncpa [#allocation3], 0  ;;  %s452_s0 = inlined_call_operand.hbm [shape: bf16[8,32], index: 0, kind: input, shape index: {}]   ;;  %s453_s1 = inlined_call_operand.hbm [shape: bf16[32,32], index: 1, kind: input, shape index: {}]   ;;  %s454_s2 = inlined_call_operand.vmem [shape: f32[1,32], index: 2, kind: input, shape index: {}]   ;;  %s455_s3 = inlined_call_operand.hbm [shape: bf16[32,128], index: 3, kind: input, shape index: {}]   ;;  %s456_s4 = inlined_call_operand.vmem [shape: f32[1,128], index: 4, kind: input, shape index: {}]   ;;  %s457_s5 = inlined_call_operand.hbm [shape: f32[8,128], index: 5, kind: output, shape index: {}]  }
   0x1   :  { %11 = vsyncpa [#allocation6], 0 }
   0x2   :  { %12 = vsyncpa [#allocation4], 0  ;;  %s352_s18 = smov [#allocation5]   ;;  %s258_s22 = scalar_lea.hbm %s453_s1, 256 }
   0x3   :  { %s28_s19 = sshll.u32 %s352_s18, 4  ;;  %p259_p0 = scmp.ne.s32.totalorder %s453_s1, %s258_s22  ;;  %s29_s19 = int_to_ptr.vmem [resolvable:$true] %s28_s19 }
   0x4   :  { %p262_p1 = scmp.lt.u32.totalorder %s258_s22, %s453_s1 }
   0x6   :  { %p264_p2 = pnand %p262_p1, %p259_p0 }
   0x8   :  { %267 = shalt.err (!%p264_p2)
}
   0x9   :  { %s268_s27 = scalar_lea.vmem %s29_s19, 256  ;;  %p273_p4 = scmp.lt.s32.totalorder %s29_s19, %s29_s19 }
   0xa   :  { %p269_p3 = scmp.ne.s32.totalorder %s29_s19, %s268_s27  ;;  %p274_p5 = scmp.lt.s32.totalorder %s268_s27, %s268_s27 }
   0xc   :  { %p275_p6 = por %p274_p5, %p273_p4 }
   0xe   :  { %p276_p7 = pnand %p275_p6, %p269_p3 }
  0x10   :  { %279 = shalt.err (!%p276_p7)
}
  0x11   :  { %s353_s28 = smov 64   ;;  %s354_s29 = smov 4  }
  0x12   :  { %34 = dma.hbm_to_vmem [thread:$0]  %s453_s1, 256, %s29_s19, [#allocation6], %s353_s28, %s353_s28, %s354_s29  }
  0x13   :  { %s355_s7 = smov [#allocation2]   ;;  %s356_s9 = smov [#allocation7]  }
  0x14   :  { %s19_s8 = sshll.u32 %s355_s7, 4  ;;  %s42_s10 = sshll.u32 %s356_s9, 4  ;;  %s20_s8 = int_to_ptr.vmem [resolvable:$true] %s19_s8  ;;  %s43_s10 = int_to_ptr.vmem [resolvable:$true] %s42_s10 }
  0x15   :  { %s280_s13 = scalar_lea.hbm %s452_s0, 64 }
  0x16   :  { %p281_p8 = scmp.ne.s32.totalorder %s452_s0, %s280_s13  ;;  %p284_p9 = scmp.lt.u32.totalorder %s280_s13, %s452_s0 }
  0x18   :  { %p286_p10 = pnand %p284_p9, %p281_p8 }
  0x1a   :  { %289 = shalt.err (!%p286_p10)
}
  0x1b   :  { %s290_s1 = scalar_lea.vmem %s20_s8, 64  ;;  %p295_p12 = scmp.lt.s32.totalorder %s20_s8, %s20_s8 }
  0x1c   :  { %p291_p11 = scmp.ne.s32.totalorder %s20_s8, %s290_s1  ;;  %p296_p13 = scmp.lt.s32.totalorder %s290_s1, %s290_s1 }
  0x1e   :  { %p297_p0 = por %p296_p13, %p295_p12 }
  0x20   :  { %p298_p1 = pnand %p297_p0, %p291_p11 }
  0x22   :  { %301 = shalt.err (!%p298_p1)
}
  0x23   :  { %22 = dma.hbm_to_vmem [thread:$0]  %s452_s0, 64, %s20_s8, [#allocation3]  }
  0x24   :  { %s302_s22 = scalar_lea.hbm %s455_s3, 256 }
  0x25   :  { %p303_p2 = scmp.ne.s32.totalorder %s455_s3, %s302_s22  ;;  %p306_p3 = scmp.lt.u32.totalorder %s302_s22, %s455_s3 }
  0x27   :  { %p308_p4 = pnand %p306_p3, %p303_p2 }
  0x29   :  { %311 = shalt.err (!%p308_p4)
}
  0x2a   :  { %s312_s27 = scalar_lea.vmem %s43_s10, 256  ;;  %p317_p6 = scmp.lt.s32.totalorder %s43_s10, %s43_s10 }
  0x2b   :  { %p313_p5 = scmp.ne.s32.totalorder %s43_s10, %s312_s27  ;;  %p318_p7 = scmp.lt.s32.totalorder %s312_s27, %s312_s27 }
  0x2d   :  { %p319_p8 = por %p318_p7, %p317_p6 }
  0x2f   :  { %p320_p9 = pnand %p319_p8, %p313_p5 }
  0x31   :  { %323 = shalt.err (!%p320_p9)
}
  0x32   :  { %48 = dma.hbm_to_vmem [thread:$0]  %s455_s3, 256, %s43_s10, [#allocation6], %s353_s28, %s353_s28, %s354_s29  }
  0x33   :  { %346 = dma.done.wait [#allocation3], 64  }
  0x34   :  { %347 = vsyncadd [#allocation3], 4294967232 }
  0x35   :  { %348 = dma.done.wait [#allocation6], 512  }
  0x36   :  { %349 = vsyncadd [#allocation6], 4294966784  ;;  %v357_v0 = vmov 0.0   ;;  %vm358_vm0 = vmmov 0   ;;  %v252_v1 = vld [vmem:[#allocation5] sm:$0xff]   ;;  %v253_v2 = vld [vmem:[#allocation5 + $0x8] sm:$0xff]  }
  0x37   :  { %228 = vmatprep.subr.bf16.mxu0 %v357_v0  ;;  %232 = vmatprep.mubr.msk.bf16.mxu0 %vm358_vm0, %v357_v0  ;;  %v61_v3 = vld [vmem:[#allocation2] sm:$0xf]  ;;  %vm85_vm1 = vcmask 261120   ;;  %v254_v4 = vld [vmem:[#allocation7] sm:$0xff]   ;;  %s359_s7 = smov [#allocation8]  }
  0x38   :  { %236 = vmatprep.subr.bf16.mxu1 %v357_v0  ;;  %240 = vmatprep.mubr.msk.bf16.mxu1 %vm358_vm0, %v357_v0  ;;  %v255_v5 = vld [vmem:[#allocation7 + $0x8] sm:$0xff]   ;;  %s204_s8 = sshll.u32 %s359_s7, 4  ;;  %s205_s8 = int_to_ptr.vmem [resolvable:$true] %s204_s8 }
  0x39   :  { %229 = vmatpush3.bf16.msra.mxu0 %v252_v1  ;;  %237 = vmatpush3.bf16.msra.mxu1 %v254_v4  ;;  %v214_v6 = vld [vmem:[%s454_s2] ss:$0 sm:$0xff]  ;;  %s324_s2 = scalar_lea.vmem %s205_s8, 128  ;;  %p329_p11 = scmp.lt.s32.totalorder %s205_s8, %s205_s8 }
  0x3a   :  { %230 = vmatprep.subr.bf16.mxu0 %v357_v0  ;;  %238 = vmatprep.subr.bf16.mxu1 %v357_v0  ;;  %v218_v14 = vld [vmem:[%s456_s4] ss:$0 sm:$0xff]  ;;  %p325_p10 = scmp.ne.s32.totalorder %s205_s8, %s324_s2  ;;  %p330_p12 = scmp.lt.s32.totalorder %s324_s2, %s324_s2 }
  0x3c   :  { %p331_p13 = por %p330_p12, %p329_p11 }
  0x3d   :  { %231 = vmatpush3.bf16.msra.mxu0 %v253_v2  ;;  %239 = vmatpush3.bf16.msra.mxu1 %v255_v5 }
  0x3e   :  { %p332_p0 = pnand %p331_p13, %p325_p10 }
  0x40   :  { %233 = vmatmul.mubr.msk.bf16.vlgmr.msra.gmra.mrb[0].mxu0 %vm85_vm1, %v61_v3 }
 0x113   :  { %v123_v7 = vpop.f32.mrb[0].mxu0 }
 0x114   :  { %v124_v8 = vadd.f32 %v214_v6, %v123_v7  ;;  %v234_v9 = vpop.f32.mrb[1].mxu0 }
 0x115   :  { %v126_v10 = vpop.f32.mrb[2].mxu0 }
 0x116   :  { %256 = vtanh.f32 %v124_v8  ;;  %v235_v11 = vpop.f32.mrb[3].mxu0 }
 0x120   :  { %v257_v12 = vpop.eup %256 }
 0x121   :  { %v130_v13 = vpack.c.bf16 %v257_v12, %v257_v12 }
 0x123   :  { %241 = vmatmul.mubr.msk.bf16.vlgmr.msra.gmra.mrb[0].mxu1 %vm85_vm1, %v130_v13 }
 0x1f6   :  { %v191_v15 = vpop.f32.mrb[0].mxu1 }
 0x1f7   :  { %v192_v16 = vadd.f32 %v218_v14, %v191_v15  ;;  %v242_v17 = vpop.f32.mrb[1].mxu1 }
 0x1f8   :  { %v194_v18 = vpop.f32.mrb[2].mxu1 }
 0x1f9   :  { %197 = vst [vmem:[#allocation8] sm:$0xff] %v192_v16  ;;  %v243_v19 = vpop.f32.mrb[3].mxu1 }
 0x1fa   :  { %335 = shalt.err (!%p332_p0)
}
 0x1fb   :  { %s336_s4 = scalar_lea.hbm %s457_s5, 128 }
 0x1fc   :  { %p337_p1 = scmp.ne.s32.totalorder %s457_s5, %s336_s4  ;;  %p340_p2 = scmp.lt.u32.totalorder %s336_s4, %s457_s5 }
 0x1fe   :  { %p342_p3 = pnand %p340_p2, %p337_p1 }
 0x200   :  { %345 = shalt.err (!%p342_p3)
}
 0x201   :  { %207 = dma.vmem_to_hbm [thread:$0]  %s205_s8, 128, %s457_s5, [#allocation4]  }
 0x202   :  { %350 = dma.done.wait [#allocation4], 128  }
 0x203   :  { %351 = vsyncadd [#allocation4], 4294967168 }
 0x204   :  { %211 = vsyncpa [#allocation3], 1 }
 0x205   :  { %212 = vsyncpa [#allocation6], 1 }
 0x206   :  { %213 = vsyncpa [#allocation4], 1 }

</bundles_post_ra>
